<compile_context>
chip_gen: v7x
topology: tpu7x:2x2x1
jax: 0.10.0
libtpu: 0.0.40
codegen_flags: <defaults>
</compile_context>

<pallas_src>
import functools

import jax
import jax.numpy as jnp
from jax.experimental import pallas as pl
from jax.experimental.pallas import tpu as pltpu

LANE = 128


def _round_up(v, m):
    return ((v + m - 1) // m) * m


def _deepset_kernel(x_ref, w1_ref, b1_ref, w2_ref, b2_ref,
                    w3_ref, b3_ref, w4_ref, b4_ref, out_ref,
                    *, n_set, normalize):
    """One grid step == one TB-row batch tile.

    x_ref : (TB*N, Din) f32  -- streamed slab of flattened set elements
    w*_ref: bf16 weights (full-array, VMEM-resident); b*_ref: f32 biases
    out_ref: (TB, 128) f32   -- lane-dense padded output slab
    """
    # Cast to bf16 in-kernel (VPU) so HBM only ever streams x once, as f32.
    xb = x_ref[...].astype(jnp.bfloat16)                               # (TB*N, Din)

    # ---- phi: Linear -> ReLU -> Linear -> ReLU (per set element) ----
    h1 = jnp.dot(xb, w1_ref[...], preferred_element_type=jnp.float32) + b1_ref[...]
    h1 = jnp.maximum(h1, 0.0).astype(jnp.bfloat16)                     # (TB*N, H)
    h2 = jnp.dot(h1, w2_ref[...], preferred_element_type=jnp.float32) + b2_ref[...]
    h2 = jnp.maximum(h2, 0.0)                                          # f32 (TB*N, H)

    # ---- sum over the set dimension (dim=1 in PyTorch), in f32 ----
    # Layout-preserving (copy-free) when n_set % 8 == 0; otherwise a VMEM copy (correct).
    tbn, hdim = h2.shape
    agg = jnp.sum(h2.reshape(tbn // n_set, n_set, hdim), axis=1)       # f32 (TB, H)

    # ---- rho: Linear -> ReLU -> Linear (batched over TB rows) ----
    r1 = jnp.dot(agg.astype(jnp.bfloat16), w3_ref[...],
                 preferred_element_type=jnp.float32) + b3_ref[...]
    r1 = jnp.maximum(r1, 0.0).astype(jnp.bfloat16)                     # (TB, H)
    out = jnp.dot(r1, w4_ref[...],
                  preferred_element_type=jnp.float32) + b4_ref[...]    # f32 (TB, 128)

    if normalize:
        # F.normalize(p=2, dim=1): x / max(||x||, 1e-12) == x * rsqrt(max(sumsq, 1e-24)).
        # Padded columns are exact zeros, so the norm over 128 lanes equals the true norm.
        sumsq = jnp.sum(out * out, axis=-1, keepdims=True)
        out = out * jax.lax.rsqrt(jnp.maximum(sumsq, 1e-24))

    out_ref[...] = out.astype(out_ref.dtype)


def _pick_batch_tile(batch, n_set, din, hdim, dout_pad):
    """VMEM-aware batch tile; multiple of 8 and >=2 grid steps once B > 8."""
    budget = 40 * 1024 * 1024  # working-set budget, safe on v5e/v6e/v7x
    # resident weights/biases (bf16 weights, f32 biases)
    weights = 2 * (din * hdim + 2 * hdim * hdim + hdim * dout_pad) + 4 * (3 * hdim + dout_pad)
    # per batch-row cost: double-buffered f32 x + h1(bf16)+h2(f32) + rho acts + out dbuf
    per_row = 2 * n_set * din * 4 + n_set * hdim * 6 + hdim * 6 + 2 * dout_pad * 4
    cap = max(8, (budget - weights) // max(per_row, 1))
    cap = max(8, (cap // 8) * 8)
    if batch <= 8:
        return batch
    # Split into >= 2 grid steps so v7x's second TensorCore gets work ("parallel" axis);
    # on v5e/v6e the extra step only costs ~0.35us.
    tb = _round_up(pl.cdiv(batch, 2), 8)
    tb = min(tb, 512, cap)
    return max(8, (tb // 8) * 8)


@functools.partial(jax.jit, static_argnames=("normalize",))
def deepset_forward(x, params, normalize=False):
    """x: (B, N, Din) float32. params: dict of f32 weights/biases. Returns (B, Dout) f32."""
    B, N, Din = x.shape
    H = params["w1"].shape[1]
    Dout = params["w4"].shape[1]
    Dpad = _round_up(max(Dout, 1), LANE)

    TB = _pick_batch_tile(B, N, Din, H, Dpad)
    num_tiles = pl.cdiv(B, TB)

    # Leading-dim collapse is a bitcast (row-major contiguous) -- no HBM copy.
    x2d = x.reshape(B * N, Din)

    # Weights bf16 (tiny one-time cast), biases f32 added after f32-accumulated matmuls.
    w1 = params["w1"].astype(jnp.bfloat16)
    w2 = params["w2"].astype(jnp.bfloat16)
    w3 = params["w3"].astype(jnp.bfloat16)
    w4 = jnp.zeros((H, Dpad), jnp.bfloat16).at[:, :Dout].set(params["w4"].astype(jnp.bfloat16))
    b1 = params["b1"].reshape(1, H).astype(jnp.float32)
    b2 = params["b2"].reshape(1, H).astype(jnp.float32)
    b3 = params["b3"].reshape(1, H).astype(jnp.float32)
    b4 = jnp.zeros((1, Dpad), jnp.float32).at[:, :Dout].set(
        params["b4"].reshape(1, Dout).astype(jnp.float32))

    # Full-array VMEM residency: copied in once, single-buffered (no per-step double-buffer).
    resident = pl.BlockSpec(memory_space=pltpu.MemorySpace.VMEM)

    kernel = functools.partial(_deepset_kernel, n_set=N, normalize=normalize)

    out = pl.pallas_call(
        kernel,
        out_shape=jax.ShapeDtypeStruct((B, Dpad), jnp.float32),
        grid_spec=pltpu.PrefetchScalarGridSpec(
            num_scalar_prefetch=0,
            grid=(num_tiles,),
            in_specs=[
                pl.BlockSpec((TB * N, Din), lambda b: (b, 0)),  # x (streamed, f32)
                resident, resident,                              # w1, b1
                resident, resident,                              # w2, b2
                resident, resident,                              # w3, b3
                resident, resident,                              # w4, b4
            ],
            out_specs=pl.BlockSpec((TB, Dpad), lambda b: (b, 0)),
        ),
        compiler_params=pltpu.CompilerParams(
            dimension_semantics=("parallel",),
            vmem_limit_bytes=48 * 1024 * 1024),
    )(x2d, w1, b1, w2, b2, w3, b3, w4, b4)

    return out[:, :Dout]


def init_deepset_params(key, input_dim, hidden_dim, output_dim):
    """Deterministic init mimicking PyTorch nn.Linear (uniform +-1/sqrt(fan_in)).

    Weights stored transposed relative to PyTorch: shape (fan_in, fan_out)."""
    def linear(key, fan_in, fan_out):
        kw, kb = jax.random.split(key)
        bound = 1.0 / jnp.sqrt(fan_in)
        w = jax.random.uniform(kw, (fan_in, fan_out), jnp.float32, -bound, bound)
        b = jax.random.uniform(kb, (1, fan_out), jnp.float32, -bound, bound)
        return w, b

    k1, k2, k3, k4 = jax.random.split(key, 4)
    w1, b1 = linear(k1, input_dim, hidden_dim)
    w2, b2 = linear(k2, hidden_dim, hidden_dim)
    w3, b3 = linear(k3, hidden_dim, hidden_dim)
    w4, b4 = linear(k4, hidden_dim, output_dim)
    return dict(w1=w1, b1=b1, w2=w2, b2=b2, w3=w3, b3=b3, w4=w4, b4=b4)


def deepset_reference(x, params, normalize=False):
    """Pure-JAX reference mirroring the kernel's bf16-operand / f32-accumulate numerics."""
    hi = jax.lax.Precision.HIGHEST
    f32, bf16 = jnp.float32, jnp.bfloat16
    mm = lambda a, b: jnp.dot(a, b, precision=hi)

    xb = x.astype(bf16).astype(f32)
    w1 = params["w1"].astype(bf16).astype(f32)
    w2 = params["w2"].astype(bf16).astype(f32)
    w3 = params["w3"].astype(bf16).astype(f32)
    w4 = params["w4"].astype(bf16).astype(f32)

    h1 = jnp.maximum(mm(xb, w1) + params["b1"], 0.0).astype(bf16).astype(f32)
    h2 = jnp.maximum(mm(h1, w2) + params["b2"], 0.0)
    agg = jnp.sum(h2, axis=1)
    r1 = jnp.maximum(mm(agg.astype(bf16).astype(f32), w3) + params["b3"], 0.0)
    r1 = r1.astype(bf16).astype(f32)
    out = mm(r1, w4) + params["b4"]
    if normalize:
        norm = jnp.sqrt(jnp.sum(out * out, axis=-1, keepdims=True))
        out = out / jnp.maximum(norm, 1e-12)
    return out


if __name__ == "__main__":
    INPUT_DIM, HIDDEN_DIM, OUTPUT_DIM, N = 16, 32, 8, 8

    key = jax.random.PRNGKey(0)
    kx, kx2, kp = jax.random.split(key, 3)
    params = init_deepset_params(kp, INPUT_DIM, HIDDEN_DIM, OUTPUT_DIM)

    # Case 1: small batch (B=2), single tile, no normalize.
    x = jax.random.normal(kx, (2, N, INPUT_DIM), jnp.float32)
    out = jax.block_until_ready(deepset_forward(x, params, normalize=False))
    ref = deepset_reference(x, params, normalize=False)
    assert out.shape == (2, OUTPUT_DIM)
    assert jnp.allclose(out, ref, atol=1e-4, rtol=1e-4), "mismatch vs reference (B=2)"

    # Case 2: B=20 exercises multi-step grid, ragged last batch tile, fused normalize.
    x2 = jax.random.normal(kx2, (20, N, INPUT_DIM), jnp.float32)
    out2 = jax.block_until_ready(deepset_forward(x2, params, normalize=True))
    ref2 = deepset_reference(x2, params, normalize=True)
    assert out2.shape == (20, OUTPUT_DIM)
    assert jnp.allclose(out2, ref2, atol=1e-4, rtol=1e-4), "mismatch vs reference (B=20)"

    print("KERNEL_OK")
</pallas_src>

<mosaic_0001>
module attributes {stable_mosaic.version = 11 : i64} {
  func.func @_deepset_kernel(%arg0: i32, %arg1: memref<16x16xf32, #tpu.memory_space<vmem>>, %arg2: memref<16x32xbf16, #tpu.memory_space<vmem>>, %arg3: memref<1x32xf32, #tpu.memory_space<vmem>>, %arg4: memref<32x32xbf16, #tpu.memory_space<vmem>>, %arg5: memref<1x32xf32, #tpu.memory_space<vmem>>, %arg6: memref<32x32xbf16, #tpu.memory_space<vmem>>, %arg7: memref<1x32xf32, #tpu.memory_space<vmem>>, %arg8: memref<32x128xbf16, #tpu.memory_space<vmem>>, %arg9: memref<1x128xf32, #tpu.memory_space<vmem>>, %arg10: memref<2x128xf32, #tpu.memory_space<vmem>>) attributes {dimension_semantics = [#tpu.dimension_semantics<parallel>], iteration_bounds = array<i64: 1>, scalar_prefetch = 0 : i64, scratch_operands = 0 : i64, tpu.core_type = #tpu.core_type<tc>, window_params = [{transform_indices = @transform_0, window_bounds = array<i64: 16, 16>}, {pipeline_mode = #tpu.pipeline_mode<synchronous>, transform_indices = @transform_1, window_bounds = array<i64: 16, 32>}, {pipeline_mode = #tpu.pipeline_mode<synchronous>, transform_indices = @transform_2, window_bounds = array<i64: 1, 32>}, {pipeline_mode = #tpu.pipeline_mode<synchronous>, transform_indices = @transform_3, window_bounds = array<i64: 32, 32>}, {pipeline_mode = #tpu.pipeline_mode<synchronous>, transform_indices = @transform_4, window_bounds = array<i64: 1, 32>}, {pipeline_mode = #tpu.pipeline_mode<synchronous>, transform_indices = @transform_5, window_bounds = array<i64: 32, 32>}, {pipeline_mode = #tpu.pipeline_mode<synchronous>, transform_indices = @transform_6, window_bounds = array<i64: 1, 32>}, {pipeline_mode = #tpu.pipeline_mode<synchronous>, transform_indices = @transform_7, window_bounds = array<i64: 32, 128>}, {pipeline_mode = #tpu.pipeline_mode<synchronous>, transform_indices = @transform_8, window_bounds = array<i64: 1, 128>}, {transform_indices = @transform_9, window_bounds = array<i64: 2, 128>}]} {
    %c0 = arith.constant 0 : index
    %c0_0 = arith.constant 0 : index
    %0 = vector.load %arg1[%c0, %c0_0] : memref<16x16xf32, #tpu.memory_space<vmem>>, vector<16x16xf32>
    %1 = arith.truncf %0 : vector<16x16xf32> to vector<16x16xbf16>
    %c0_1 = arith.constant 0 : index
    %c0_2 = arith.constant 0 : index
    %2 = vector.load %arg2[%c0_1, %c0_2] : memref<16x32xbf16, #tpu.memory_space<vmem>>, vector<16x32xbf16>
    %cst = arith.constant dense<0.000000e+00> : vector<16x32xf32>
    %3 = tpu.matmul %1, %2, %cst {dimension_numbers = #tpu.dot_dimension_numbers<[1], [0], [0], [1], [0, 0, 1, 1], [], []>} : vector<16x16xbf16>, vector<16x32xbf16>, vector<16x32xf32> -> vector<16x32xf32>
    %c0_3 = arith.constant 0 : index
    %c0_4 = arith.constant 0 : index
    %4 = vector.load %arg3[%c0_3, %c0_4] : memref<1x32xf32, #tpu.memory_space<vmem>>, vector<1x32xf32>
    %5 = vector.broadcast %4 : vector<1x32xf32> to vector<16x32xf32>
    %6 = arith.addf %3, %5 : vector<16x32xf32>
    %cst_5 = arith.constant 0.000000e+00 : f32
    %7 = vector.broadcast %cst_5 : f32 to vector<16x32xf32>
    %8 = arith.maximumf %6, %7 : vector<16x32xf32>
    %9 = arith.truncf %8 : vector<16x32xf32> to vector<16x32xbf16>
    %c0_6 = arith.constant 0 : index
    %c0_7 = arith.constant 0 : index
    %10 = vector.load %arg4[%c0_6, %c0_7] : memref<32x32xbf16, #tpu.memory_space<vmem>>, vector<32x32xbf16>
    %cst_8 = arith.constant dense<0.000000e+00> : vector<16x32xf32>
    %11 = tpu.matmul %9, %10, %cst_8 {dimension_numbers = #tpu.dot_dimension_numbers<[1], [0], [0], [1], [0, 0, 1, 1], [], []>} : vector<16x32xbf16>, vector<32x32xbf16>, vector<16x32xf32> -> vector<16x32xf32>
    %c0_9 = arith.constant 0 : index
    %c0_10 = arith.constant 0 : index
    %12 = vector.load %arg5[%c0_9, %c0_10] : memref<1x32xf32, #tpu.memory_space<vmem>>, vector<1x32xf32>
    %13 = vector.broadcast %12 : vector<1x32xf32> to vector<16x32xf32>
    %14 = arith.addf %11, %13 : vector<16x32xf32>
    %cst_11 = arith.constant 0.000000e+00 : f32
    %15 = vector.broadcast %cst_11 : f32 to vector<16x32xf32>
    %16 = arith.maximumf %14, %15 : vector<16x32xf32>
    %17 = vector.shape_cast %16 : vector<16x32xf32> to vector<2x8x32xf32>
    %cst_12 = arith.constant dense<0.000000e+00> : vector<2x32xf32>
    %18 = vector.multi_reduction <add>, %17, %cst_12 [1] : vector<2x8x32xf32> to vector<2x32xf32>
    %19 = arith.truncf %18 : vector<2x32xf32> to vector<2x32xbf16>
    %c0_13 = arith.constant 0 : index
    %c0_14 = arith.constant 0 : index
    %20 = vector.load %arg6[%c0_13, %c0_14] : memref<32x32xbf16, #tpu.memory_space<vmem>>, vector<32x32xbf16>
    %cst_15 = arith.constant dense<0.000000e+00> : vector<2x32xf32>
    %21 = tpu.matmul %19, %20, %cst_15 {dimension_numbers = #tpu.dot_dimension_numbers<[1], [0], [0], [1], [0, 0, 1, 1], [], []>} : vector<2x32xbf16>, vector<32x32xbf16>, vector<2x32xf32> -> vector<2x32xf32>
    %c0_16 = arith.constant 0 : index
    %c0_17 = arith.constant 0 : index
    %22 = vector.load %arg7[%c0_16, %c0_17] : memref<1x32xf32, #tpu.memory_space<vmem>>, vector<1x32xf32>
    %23 = vector.broadcast %22 : vector<1x32xf32> to vector<2x32xf32>
    %24 = arith.addf %21, %23 : vector<2x32xf32>
    %cst_18 = arith.constant 0.000000e+00 : f32
    %25 = vector.broadcast %cst_18 : f32 to vector<2x32xf32>
    %26 = arith.maximumf %24, %25 : vector<2x32xf32>
    %27 = arith.truncf %26 : vector<2x32xf32> to vector<2x32xbf16>
    %c0_19 = arith.constant 0 : index
    %c0_20 = arith.constant 0 : index
    %28 = vector.load %arg8[%c0_19, %c0_20] : memref<32x128xbf16, #tpu.memory_space<vmem>>, vector<32x128xbf16>
    %cst_21 = arith.constant dense<0.000000e+00> : vector<2x128xf32>
    %29 = tpu.matmul %27, %28, %cst_21 {dimension_numbers = #tpu.dot_dimension_numbers<[1], [0], [0], [1], [0, 0, 1, 1], [], []>} : vector<2x32xbf16>, vector<32x128xbf16>, vector<2x128xf32> -> vector<2x128xf32>
    %c0_22 = arith.constant 0 : index
    %c0_23 = arith.constant 0 : index
    %30 = vector.load %arg9[%c0_22, %c0_23] : memref<1x128xf32, #tpu.memory_space<vmem>>, vector<1x128xf32>
    %31 = vector.broadcast %30 : vector<1x128xf32> to vector<2x128xf32>
    %32 = arith.addf %29, %31 : vector<2x128xf32>
    %c0_24 = arith.constant 0 : index
    %c0_25 = arith.constant 0 : index
    %33 = vector.load %arg10[%c0_24, %c0_25] : memref<2x128xf32, #tpu.memory_space<vmem>>, vector<2x128xf32>
    tpu.vector_store %arg10[%c0_24, %c0_25], %32 {strides = array<i32>} : memref<2x128xf32, #tpu.memory_space<vmem>>, vector<2x128xf32>,
    return
  }
  func.func @transform_0(%arg0: i32) -> (i32, i32) {
    %c0_i32 = arith.constant 0 : i32
    %c0_i32_0 = arith.constant 0 : i32
    return %arg0, %c0_i32 : i32, i32
  }
  func.func @transform_1(%arg0: i32) -> (i32, i32) {
    %c0_i32 = arith.constant 0 : i32
    %c0_i32_0 = arith.constant 0 : i32
    %c0_i32_1 = arith.constant 0 : i32
    return %c0_i32, %c0_i32_0 : i32, i32
  }
  func.func @transform_2(%arg0: i32) -> (i32, i32) {
    %c0_i32 = arith.constant 0 : i32
    %c0_i32_0 = arith.constant 0 : i32
    %c0_i32_1 = arith.constant 0 : i32
    return %c0_i32, %c0_i32_0 : i32, i32
  }
  func.func @transform_3(%arg0: i32) -> (i32, i32) {
    %c0_i32 = arith.constant 0 : i32
    %c0_i32_0 = arith.constant 0 : i32
    %c0_i32_1 = arith.constant 0 : i32
    return %c0_i32, %c0_i32_0 : i32, i32
  }
  func.func @transform_4(%arg0: i32) -> (i32, i32) {
    %c0_i32 = arith.constant 0 : i32
    %c0_i32_0 = arith.constant 0 : i32
    %c0_i32_1 = arith.constant 0 : i32
    return %c0_i32, %c0_i32_0 : i32, i32
  }
  func.func @transform_5(%arg0: i32) -> (i32, i32) {
    %c0_i32 = arith.constant 0 : i32
    %c0_i32_0 = arith.constant 0 : i32
    %c0_i32_1 = arith.constant 0 : i32
    return %c0_i32, %c0_i32_0 : i32, i32
  }
  func.func @transform_6(%arg0: i32) -> (i32, i32) {
    %c0_i32 = arith.constant 0 : i32
    %c0_i32_0 = arith.constant 0 : i32
    %c0_i32_1 = arith.constant 0 : i32
    return %c0_i32, %c0_i32_0 : i32, i32
  }
  func.func @transform_7(%arg0: i32) -> (i32, i32) {
    %c0_i32 = arith.constant 0 : i32
    %c0_i32_0 = arith.constant 0 : i32
    %c0_i32_1 = arith.constant 0 : i32
    return %c0_i32, %c0_i32_0 : i32, i32
  }
  func.func @transform_8(%arg0: i32) -> (i32, i32) {
    %c0_i32 = arith.constant 0 : i32
    %c0_i32_0 = arith.constant 0 : i32
    %c0_i32_1 = arith.constant 0 : i32
    return %c0_i32, %c0_i32_0 : i32, i32
  }
  func.func @transform_9(%arg0: i32) -> (i32, i32) {
    %c0_i32 = arith.constant 0 : i32
    %c0_i32_0 = arith.constant 0 : i32
    return %arg0, %c0_i32 : i32, i32
  }
}

</mosaic_0001>

<bundles_post_ra>
// kernel: deepset_forward.1
= control target key start
LH: loop header
LB: loop body
LE: loop exit
PB: predicated region body
PF: predicated region fallthrough
CT: control target
= control target key end

     0   :  { %v432_v1 = vmov 0.0   ;;  %vm52_vm0 = vcmask 130048   ;;  %vm433_vm1 = vmmov 0   ;;  %s545_s0 = inlined_call_operand.vmem [shape: f32[16,16], index: 0, kind: input, shape index: {}]   ;;  %s546_s1 = inlined_call_operand.vmem [shape: bf16[16,32], index: 1, kind: input, shape index: {}]   ;;  %s547_s2 = inlined_call_operand.vmem [shape: f32[1,32], index: 2, kind: input, shape index: {}]   ;;  %s548_s3 = inlined_call_operand.vmem [shape: bf16[32,32], index: 3, kind: input, shape index: {}]   ;;  %s549_s4 = inlined_call_operand.vmem [shape: f32[1,32], index: 4, kind: input, shape index: {}]   ;;  %s550_s5 = inlined_call_operand.vmem [shape: bf16[32,32], index: 5, kind: input, shape index: {}]   ;;  %s551_s6 = inlined_call_operand.vmem [shape: f32[1,32], index: 6, kind: input, shape index: {}]   ;;  %s552_s7 = inlined_call_operand.vmem [shape: bf16[32,128], index: 7, kind: input, shape index: {}]   ;;  %s553_s8 = inlined_call_operand.vmem [shape: f32[1,128], index: 8, kind: input, shape index: {}]   ;;  %s554_s9 = inlined_call_operand.hbm [shape: f32[2,128], index: 9, kind: output, shape index: {}]  }
   0x1   :  { %v401_v0 = vld [vmem:[%s546_s1] sm:$0xff]   ;;  %368 = vmatprep.subr.bf16.mxu0 %v432_v1  ;;  %v35_v3 = vld [vmem:[%s545_s0 + $0x8] sm:$0xff]  ;;  %374 = vmatprep.subr.bf16.mxu1 %v432_v1 }
   0x2   :  { %v34_v2 = vld [vmem:[%s545_s0] sm:$0xff]  ;;  %369 = vmatpush3.bf16.msra.mxu0 %v401_v0  ;;  %370 = vmatprep.mubr.msk.bf16.mxu0 %vm433_vm1, %v432_v1 }
   0x3   :  { %v36_v4 = vpack.c.bf16 %v35_v3, %v34_v2  ;;  %378 = vmatprep.mubr.msk.bf16.mxu1 %vm433_vm1, %v432_v1  ;;  %382 = vmatprep.subr.bf16.mxu0 %v432_v1 }
   0x5   :  { %371 = vmatmul.mubr.msk.bf16.vlgmr.msra.gmra.mrb[0].mxu0 %vm52_vm0, %v36_v4 }
   0x6   :  { %386 = vmatprep.mubr.msk.bf16.mxu0 %vm433_vm1, %v432_v1 }
   0x7   :  { %14 = vsyncpa [#allocation3], 0  ;;  %v402_v5 = vld [vmem:[%s548_s3] sm:$0xff]   ;;  %v403_v6 = vld [vmem:[%s548_s3 + $0x8] sm:$0xff]   ;;  %vm123_vm2 = vcmask 261120   ;;  %vm201_vm3 = vcmask 1041409  }
   0x8   :  { %375 = vmatpush3.bf16.msra.mxu1 %v402_v5  ;;  %v342_v7 = vld [vmem:[%s547_s2] ss:$0 sm:$0xff]  ;;  %v405_v18 = vld [vmem:[%s550_s5 + $0x8] sm:$0xff]   ;;  %s434_s29 = smov [#allocation2]  }
   0x9   :  { %376 = vmatprep.subr.bf16.mxu1 %v432_v1  ;;  %v404_v17 = vld [vmem:[%s550_s5] sm:$0xff]   ;;  %v407_v49 = vld [vmem:[%s552_s7 + $0x8] sm:$0xff]  }
   0xa   :  { %383 = vmatpush3.bf16.msra.mxu0 %v404_v17  ;;  %v406_v19 = vld [vmem:[%s552_s7] sm:$0xff]   ;;  %s334_s7 = sshll.u32 %s434_s29, 4  ;;  %s335_s7 = int_to_ptr.vmem [resolvable:$true] %s334_s7 }
   0xb   :  { %384 = vmatprep.subr.bf16.mxu0 %v432_v1  ;;  %v345_v20 = vld [vmem:[%s549_s4] ss:$0 sm:$0xff]  ;;  %p413_p1 = scmp.lt.s32.totalorder %s335_s7, %s335_s7 }
   0xc   :  { %377 = vmatpush3.bf16.msra.mxu1 %v403_v6  ;;  %v349_v50 = vld [vmem:[%s551_s6] ss:$0 sm:$0xff]  ;;  %s408_s6 = scalar_lea.vmem %s335_s7, 32 }
   0xd   :  { %390 = vmatprep.subr.bf16.mxu1 %v432_v1  ;;  %v353_v58 = vld [vmem:[%s553_s8] ss:$0 sm:$0xff]  ;;  %p409_p0 = scmp.ne.s32.totalorder %s335_s7, %s408_s6  ;;  %p414_p2 = scmp.lt.s32.totalorder %s408_s6, %s408_s6 }
   0xe   :  { %385 = vmatpush3.bf16.msra.mxu0 %v405_v18 }
   0xf   :  { %p415_p3 = por %p414_p2, %p413_p1 }
  0x11   :  { %p416_p4 = pnand %p415_p3, %p409_p0 }
  0xd8   :  { %v90_v8 = vpop.f32.mrb[0].mxu0 }
  0xd9   :  { %v91_v9 = vadd.f32 %v342_v7, %v90_v8  ;;  %v372_v10 = vpop.f32.mrb[1].mxu0 }
  0xda   :  { %v93_v11 = vpop.f32.mrb[2].mxu0 }
  0xdb   :  { %v94_v12 = vadd.f32 %v342_v7, %v93_v11  ;;  %v373_v13 = vpop.f32.mrb[3].mxu0  ;;  %v97_v14 = vmax.f32 %v91_v9, 0.0 }
  0xdd   :  { %v98_v15 = vmax.f32 %v94_v12, 0.0 }
  0xdf   :  { %v99_v16 = vpack.c.bf16 %v98_v15, %v97_v14 }
  0xe1   :  { %379 = vmatmul.mubr.msk.bf16.vlgmr.msra.gmra.mrb[0].mxu1 %vm123_vm2, %v99_v16 }
  0xe2   :  { %394 = vmatprep.mubr.msk.bf16.mxu1 %vm433_vm1, %v432_v1  ;;  %391 = vmatpush3.bf16.msra.mxu1 %v406_v19 }
  0xe3   :  { %392 = vmatprep.subr.bf16.mxu1 %v432_v1 }
  0xe6   :  { %393 = vmatpush3.bf16.msra.mxu1 %v407_v49 }
 0x1b4   :  { %v161_v21 = vpop.f32.mrb[0].mxu1 }
 0x1b5   :  { %v162_v22 = vadd.f32 %v345_v20, %v161_v21  ;;  %v380_v23 = vpop.f32.mrb[1].mxu1 }
 0x1b6   :  { %v164_v24 = vpop.f32.mrb[2].mxu1 }
 0x1b7   :  { %v168_v25 = vmax.f32 %v162_v22, 0.0  ;;  %v165_v26 = vadd.f32 %v345_v20, %v164_v24  ;;  %v381_v27 = vpop.f32.mrb[3].mxu1 }
 0x1b9   :  { %v170_v28 = vsel %vm123_vm2, %v168_v25, 0.0  ;;  %v169_v29 = vmax.f32 %v165_v26, 0.0 }
 0x1ba   :  { %v171_v30 = vrot.slane %v170_v28, 4 }
 0x1bb   :  { %v177_v31 = vsel %vm123_vm2, %v169_v29, 0.0 }
 0x1bc   :  { %v172_v32 = vadd.f32 %v171_v30, %v170_v28  ;;  %v178_v33 = vrot.slane %v177_v31, 4 }
 0x1be   :  { %v173_v34 = vrot.slane %v172_v32, 2  ;;  %v179_v35 = vadd.f32 %v178_v33, %v177_v31 }
 0x1c0   :  { %v174_v36 = vadd.f32 %v173_v34, %v172_v32  ;;  %v180_v37 = vrot.slane %v179_v35, 2 }
 0x1c2   :  { %v175_v38 = vrot.slane %v174_v36, 1  ;;  %v181_v39 = vadd.f32 %v180_v37, %v179_v35 }
 0x1c4   :  { %v176_v40 = vadd.f32 %v175_v38, %v174_v36  ;;  %v182_v41 = vrot.slane %v181_v39, 1 }
 0x1c6   :  { %v184_v42 = vpack.c.bf16 %v176_v40, %v176_v40  ;;  %v183_v43 = vadd.f32 %v182_v41, %v181_v39 }
 0x1c8   :  { %v185_v44 = vpack.c.bf16 %v183_v43, %v183_v43  ;;  %v199_v45 = vunpack.c.l.b16 %v184_v42 }
 0x1ca   :  { %v200_v46 = vunpack.c.l.b16 %v185_v44 }
 0x1cc   :  { %v202_v47 = vsel %vm201_vm3, %v200_v46, %v199_v45 }
 0x1cd   :  { %v203_v48 = vpack.c.b16 %v202_v47, %v202_v47 }
 0x1cf   :  { %387 = vmatmul.mubr.msk.bf16.vlgmr.msra.gmra.mrb[4].mxu0 %vm123_vm2, %v203_v48 }
 0x2a2   :  { %v253_v51 = vpop.f32.mrb[4].mxu0 }
 0x2a3   :  { %v254_v52 = vadd.f32 %v349_v50, %v253_v51  ;;  %v388_v53 = vpop.f32.mrb[5].mxu0 }
 0x2a4   :  { %v256_v54 = vpop.f32.mrb[6].mxu0 }
 0x2a5   :  { %v259_v55 = vmax.f32 %v254_v52, 0.0  ;;  %v389_v56 = vpop.f32.mrb[7].mxu0 }
 0x2a7   :  { %v260_v57 = vpack.c.bf16 %v259_v55, %v259_v55 }
 0x2a9   :  { %395 = vmatmul.mubr.msk.bf16.vlgmr.msra.gmra.mrb[4].mxu1 %vm123_vm2, %v260_v57 }
 0x37c   :  { %v321_v59 = vpop.f32.mrb[4].mxu1 }
 0x37d   :  { %v322_v60 = vadd.f32 %v353_v58, %v321_v59  ;;  %v396_v61 = vpop.f32.mrb[5].mxu1 }
 0x37e   :  { %v324_v62 = vpop.f32.mrb[6].mxu1 }
 0x37f   :  { %327 = vst [vmem:[#allocation2] sm:$0x3] %v322_v60  ;;  %v397_v63 = vpop.f32.mrb[7].mxu1 }
 0x380   :  { %419 = shalt.err (!%p416_p4)
}
 0x381   :  { %s420_s8 = scalar_lea.hbm %s554_s9, 32 }
 0x382   :  { %p421_p5 = scmp.ne.s32.totalorder %s554_s9, %s420_s8  ;;  %p424_p6 = scmp.lt.u32.totalorder %s420_s8, %s554_s9 }
 0x384   :  { %p426_p7 = pnand %p424_p6, %p421_p5 }
 0x386   :  { %429 = shalt.err (!%p426_p7)
}
 0x387   :  { %337 = dma.vmem_to_hbm [thread:$0]  %s335_s7, 32, %s554_s9, [#allocation3]  }
 0x388   :  { %430 = dma.done.wait [#allocation3], 32  }
 0x389   :  { %431 = vsyncadd [#allocation3], 4294967264 }
 0x38a   :  { %341 = vsyncpa [#allocation3], 1 }

</bundles_post_ra>
